<compile_context>
chip_gen: v5e
topology: v5e:2x2
jax: 0.10.0
libtpu: 0.0.40
codegen_flags: <defaults>
</compile_context>

<pallas_src>
import jax
import jax.numpy as jnp
from jax.experimental import pallas as pl
from jax.experimental.pallas import tpu as pltpu

LANES = 128


def _round_up(x, m):
    return -(-x // m) * m


def _chip_info():
    """Return (tensorcores to split over, per-input block byte budget)."""
    try:
        kind = jax.devices()[0].device_kind.lower().replace(" ", "")
    except Exception:
        kind = ""
    is_v7 = ("v7" in kind) or ("tpu7" in kind)
    if is_v7:
        # 2 TCs; 2 inputs x 2 bufs x 4 MiB = 16 MiB (< 32 MiB scoped default).
        return 2, 4 << 20
    # 1 TC; 2 inputs x 2 bufs x 2 MiB = 8 MiB (< 16 MiB v5e scoped default).
    return 1, 2 << 20


def _as_rows_lanes(x):
    """A 2-D row-major (rows, cols) view of x, avoiding HBM copies when possible."""
    n = int(x.size)
    if n % LANES == 0:                       # common case: free reshape, 128 lanes
        return x.reshape(n // LANES, LANES)
    last = int(x.shape[-1]) if x.ndim >= 1 else 1
    if 1 < last <= 4 * LANES:                # natural last dim as lane dim (no copy)
        return x.reshape(n // last, last)
    # Pathological shapes only (last dim 1 / huge odd-length 1-D): zero-pad.
    # Identical zero padding of y and yhat contributes 0 to the squared sum.
    pad = (-n) % LANES
    return jnp.pad(jnp.ravel(x), (0, pad)).reshape((n + pad) // LANES, LANES)


def _make_mse_kernel(rows, cols, tile_r, blocks_per_half, masked_tail):
    fold8 = (tile_r % 8 == 0)

    def _fold(sq):
        if fold8:
            # Vreg-wise sublane-group adds into the small (8, cols) accumulator.
            return jnp.sum(sq.reshape(tile_r // 8, 8, cols), axis=0)
        return sq  # tiny single-tile case: accumulator is (tile_r, cols)

    def kernel(y_ref, t_ref, out_ref, acc_ref):
        p = pl.program_id(0)  # half index (v7x: one half per TensorCore)
        k = pl.program_id(1)  # tile index within the half (reduction axis)

        @pl.when(k == 0)
        def _():
            acc_ref[...] = jnp.zeros_like(acc_ref)

        def _diff():
            return y_ref[...].astype(jnp.float32) - t_ref[...].astype(jnp.float32)

        if masked_tail:
            base_row = (p * blocks_per_half + k) * tile_r

            @pl.when(base_row + tile_r <= rows)          # interior tiles: no mask work
            def _():
                d = _diff()
                acc_ref[...] += _fold(d * d)

            @pl.when(base_row + tile_r > rows)           # tail / clamped duplicate tile
            def _():
                row_ids = base_row + jax.lax.broadcasted_iota(
                    jnp.int32, (tile_r, 1), 0)
                d = jnp.where(row_ids < rows, _diff(), 0.0)
                acc_ref[...] += _fold(d * d)
        else:
            d = _diff()
            acc_ref[...] += _fold(d * d)

        @pl.when(k == pl.num_programs(1) - 1)
        def _():
            out_ref[0, 0] = jnp.sum(acc_ref[...])

    return kernel


def mse_loss(y, yhat):
    """Mean squared error over all elements (torch.nn.MSELoss, reduction='mean')."""
    assert y.shape == yhat.shape, "y and yhat must have the same shape"
    n = int(y.size)
    assert n > 0

    y2 = _as_rows_lanes(y)
    t2 = _as_rows_lanes(yhat)
    rows, cols = y2.shape
    itemsize = jnp.dtype(y2.dtype).itemsize
    granule = {1: 32, 2: 16}.get(itemsize, 8)       # dtype-aware sublane multiple

    num_tc, block_bytes = _chip_info()

    # Rows per tile: as large as the block budget allows, then rounded so the
    # tiles (nearly) evenly cover `rows` (no almost-empty edge blocks).
    vmem_row_bytes = _round_up(cols, LANES) * itemsize   # lane-padded VMEM footprint
    cap = max(granule, (block_bytes // vmem_row_bytes) // granule * granule)
    n_tiles = pl.cdiv(rows, cap)
    if num_tc == 2 and n_tiles > 1 and n_tiles % 2:
        n_tiles += 1                                     # avoid a clamped duplicate tile
    tile_r = _round_up(pl.cdiv(rows, n_tiles), granule)
    if tile_r >= rows:
        tile_r, n_tiles = rows, 1                        # full-dim block (any row count)
    else:
        n_tiles = pl.cdiv(rows, tile_r)

    num_halves = 2 if (num_tc == 2 and n_tiles >= 2) else 1
    blocks_per_half = pl.cdiv(n_tiles, num_halves)
    masked_tail = (num_halves * blocks_per_half * tile_r) != rows
    need_clamp = (num_halves * blocks_per_half) != n_tiles

    if need_clamp:
        def in_idx(p, k):
            # Never let the auto-DMA walk past the last tile; the duplicate
            # clamped tile is fully masked inside the kernel.
            return (jnp.minimum(p * blocks_per_half + k, n_tiles - 1), 0)
    else:
        def in_idx(p, k):
            return (p * blocks_per_half + k, 0)

    acc_rows = 8 if tile_r % 8 == 0 else tile_r

    # TODO(synk): if per-step DMA is still exposed on v7x, add
    # pipeline_mode=pl.Buffered(3) to the two input BlockSpecs.
    partials = pl.pallas_call(
        _make_mse_kernel(rows, cols, tile_r, blocks_per_half, masked_tail),
        out_shape=jax.ShapeDtypeStruct((num_halves, 1), jnp.float32),
        grid=(num_halves, blocks_per_half),
        in_specs=[
            pl.BlockSpec((tile_r, cols), in_idx),
            pl.BlockSpec((tile_r, cols), in_idx),
        ],
        out_specs=pl.BlockSpec((1, 1), lambda p, k: (p, 0),
                               memory_space=pltpu.SMEM),
        scratch_shapes=[pltpu.VMEM((acc_rows, cols), jnp.float32)],
        compiler_params=pltpu.CompilerParams(
            dimension_semantics=("parallel", "arbitrary")),
    )(y2, t2)

    # Combine the (<=2) per-core partial sums; 1/N is a static constant.
    return jnp.sum(partials) * jnp.float32(1.0 / n)


if __name__ == "__main__":
    key = jax.random.PRNGKey(0)
    ks = jax.random.split(key, 10)

    def ref_mse(a, b):
        return jnp.mean((a.astype(jnp.float32) - b.astype(jnp.float32)) ** 2)

    # 1) Small regression-style (B, C, H, W) target, lane-aligned.
    y = jax.random.normal(ks[0], (2, 4, 16, 16), dtype=jnp.float32)
    yh = jax.random.normal(ks[1], (2, 4, 16, 16), dtype=jnp.float32)
    out = mse_loss(y, yh)
    jax.block_until_ready(out)
    assert jnp.allclose(out, ref_mse(y, yh), rtol=1e-5, atol=1e-6), (out, ref_mse(y, yh))

    # 2) Non-lane-aligned element count: natural last dim (7) used as lane dim.
    y2 = jax.random.normal(ks[2], (3, 5, 7), dtype=jnp.float32)
    yh2 = jax.random.normal(ks[3], (3, 5, 7), dtype=jnp.float32)
    out2 = mse_loss(y2, yh2)
    jax.block_until_ready(out2)
    assert jnp.allclose(out2, ref_mse(y2, yh2), rtol=1e-5, atol=1e-6), (out2, ref_mse(y2, yh2))

    # 3) Odd last dim but lane-aligned total (rows=1040 -> one 1040-row tile).
    y3 = jax.random.normal(ks[4], (4, 8, 64, 65), dtype=jnp.float32)
    yh3 = jax.random.normal(ks[5], (4, 8, 64, 65), dtype=jnp.float32)
    out3 = mse_loss(y3, yh3)
    jax.block_until_ready(out3)
    assert jnp.allclose(out3, ref_mse(y3, yh3), rtol=1e-5, atol=1e-5), (out3, ref_mse(y3, yh3))

    # 4) Multi-tile case: exercises the gated tail mask (and the 2-half axis on v7x).
    y4 = jax.random.normal(ks[6], (4161, 128), dtype=jnp.float32)
    yh4 = jax.random.normal(ks[7], (4161, 128), dtype=jnp.float32)
    out4 = mse_loss(y4, yh4)
    jax.block_until_ready(out4)
    assert jnp.allclose(out4, ref_mse(y4, yh4), rtol=1e-5, atol=1e-5), (out4, ref_mse(y4, yh4))

    # 5) bf16 inputs (16-row sublane granule path, f32 widening in-kernel).
    y5 = jax.random.normal(ks[8], (2, 4, 16, 16), dtype=jnp.bfloat16)
    yh5 = jax.random.normal(ks[9], (2, 4, 16, 16), dtype=jnp.bfloat16)
    out5 = mse_loss(y5, yh5)
    jax.block_until_ready(out5)
    assert jnp.allclose(out5, ref_mse(y5, yh5), rtol=1e-4, atol=1e-5), (out5, ref_mse(y5, yh5))

    print("KERNEL_OK")
</pallas_src>

<mosaic_0001>
module attributes {stable_mosaic.version = 11 : i64} {
  func.func @kernel(%arg0: i32, %arg1: i32, %arg2: memref<16x128xf32, #tpu.memory_space<vmem>>, %arg3: memref<16x128xf32, #tpu.memory_space<vmem>>, %arg4: memref<1x1xf32, #tpu.memory_space<smem>>, %arg5: memref<8x128xf32, #tpu.memory_space<vmem>>) attributes {dimension_semantics = [#tpu.dimension_semantics<parallel>, #tpu.dimension_semantics<arbitrary>], iteration_bounds = array<i64: 1, 1>, scalar_prefetch = 0 : i64, scratch_operands = 1 : i64, tpu.core_type = #tpu.core_type<tc>, window_params = [{transform_indices = @transform_0, window_bounds = array<i64: 16, 128>}, {transform_indices = @transform_1, window_bounds = array<i64: 16, 128>}, {transform_indices = @transform_2, window_bounds = array<i64: 1, 1>}]} {
    %c0_i32 = arith.constant 0 : i32
    %0 = arith.cmpi eq, %arg1, %c0_i32 : i32
    %1 = arith.extui %0 : i1 to i32
    %c0_i32_0 = arith.constant 0 : i32
    %2 = arith.cmpi ne, %1, %c0_i32_0 : i32
    scf.if %2 {
      %cst_10 = arith.constant 0.000000e+00 : f32
      %15 = vector.broadcast %cst_10 : f32 to vector<8x128xf32>
      %c0_11 = arith.constant 0 : index
      %c0_12 = arith.constant 0 : index
      %16 = vector.load %arg5[%c0_11, %c0_12] : memref<8x128xf32, #tpu.memory_space<vmem>>, vector<8x128xf32>
      tpu.vector_store %arg5[%c0_11, %c0_12], %15 {strides = array<i32>} : memref<8x128xf32, #tpu.memory_space<vmem>>, vector<8x128xf32>,
    } else {
    }
    %c0 = arith.constant 0 : index
    %c0_1 = arith.constant 0 : index
    %3 = vector.load %arg2[%c0, %c0_1] : memref<16x128xf32, #tpu.memory_space<vmem>>, vector<16x128xf32>
    %c0_2 = arith.constant 0 : index
    %c0_3 = arith.constant 0 : index
    %4 = vector.load %arg3[%c0_2, %c0_3] : memref<16x128xf32, #tpu.memory_space<vmem>>, vector<16x128xf32>
    %5 = arith.subf %3, %4 : vector<16x128xf32>
    %c0_4 = arith.constant 0 : index
    %c0_5 = arith.constant 0 : index
    %6 = vector.load %arg5[%c0_4, %c0_5] : memref<8x128xf32, #tpu.memory_space<vmem>>, vector<8x128xf32>
    %7 = arith.mulf %5, %5 : vector<16x128xf32>
    %8 = vector.shape_cast %7 : vector<16x128xf32> to vector<2x8x128xf32>
    %cst = arith.constant dense<0.000000e+00> : vector<8x128xf32>
    %9 = vector.multi_reduction <add>, %8, %cst [0] : vector<2x8x128xf32> to vector<8x128xf32>
    %10 = arith.addf %6, %9 : vector<8x128xf32>
    %c0_6 = arith.constant 0 : index
    %c0_7 = arith.constant 0 : index
    %11 = vector.load %arg5[%c0_6, %c0_7] : memref<8x128xf32, #tpu.memory_space<vmem>>, vector<8x128xf32>
    tpu.vector_store %arg5[%c0_6, %c0_7], %10 {strides = array<i32>} : memref<8x128xf32, #tpu.memory_space<vmem>>, vector<8x128xf32>,
    %c0_i32_8 = arith.constant 0 : i32
    %12 = arith.cmpi eq, %arg1, %c0_i32_8 : i32
    %13 = arith.extui %12 : i1 to i32
    %c0_i32_9 = arith.constant 0 : i32
    %14 = arith.cmpi ne, %13, %c0_i32_9 : i32
    scf.if %14 {
      %c0_10 = arith.constant 0 : index
      %c0_11 = arith.constant 0 : index
      %15 = vector.load %arg5[%c0_10, %c0_11] : memref<8x128xf32, #tpu.memory_space<vmem>>, vector<8x128xf32>
      %16 = vector.shape_cast %15 : vector<8x128xf32> to vector<1x8x128xf32>
      %cst_12 = arith.constant dense<0.000000e+00> : vector<1xf32>
      %17 = vector.multi_reduction <add>, %16, %cst_12 [1, 2] : vector<1x8x128xf32> to vector<1xf32>
      %18 = vector.shape_cast %17 : vector<1xf32> to vector<1x1x1xf32>
      %19 = vector.extract %18[0, 0, 0] : f32 from vector<1x1x1xf32>
      %c0_13 = arith.constant 0 : index
      %c0_14 = arith.constant 0 : index
      %20 = memref.load %arg4[%c0_13, %c0_14] : memref<1x1xf32, #tpu.memory_space<smem>>
      memref.store %19, %arg4[%c0_13, %c0_14] : memref<1x1xf32, #tpu.memory_space<smem>>
    } else {
    }
    return
  }
  func.func @transform_0(%arg0: i32, %arg1: i32) -> (i32, i32) {
    %c1_i32 = arith.constant 1 : i32
    %0 = arith.muli %arg0, %c1_i32 : i32
    %1 = arith.addi %0, %arg1 : i32
    %c0_i32 = arith.constant 0 : i32
    %c0_i32_0 = arith.constant 0 : i32
    return %1, %c0_i32 : i32, i32
  }
  func.func @transform_1(%arg0: i32, %arg1: i32) -> (i32, i32) {
    %c1_i32 = arith.constant 1 : i32
    %0 = arith.muli %arg0, %c1_i32 : i32
    %1 = arith.addi %0, %arg1 : i32
    %c0_i32 = arith.constant 0 : i32
    %c0_i32_0 = arith.constant 0 : i32
    return %1, %c0_i32 : i32, i32
  }
  func.func @transform_2(%arg0: i32, %arg1: i32) -> (i32, i32) {
    %c0_i32 = arith.constant 0 : i32
    %c0_i32_0 = arith.constant 0 : i32
    return %arg0, %c0_i32 : i32, i32
  }
}

</mosaic_0001>

<bundles_post_ra>
// kernel: tpu_custom_call.1
= control target key start
LH: loop header
LB: loop body
LE: loop exit
PB: predicated region body
PF: predicated region fallthrough
CT: control target
= control target key end

     0   :  { %7 = vsyncpa [#allocation4], 0  ;;  %s207_s0 = inlined_call_operand.hbm [shape: f32[16,128], index: 0, kind: input, shape index: {}]   ;;  %s208_s1 = inlined_call_operand.hbm [shape: f32[16,128], index: 1, kind: input, shape index: {}]   ;;  %s209_s2 = inlined_call_operand.hbm [shape: f32[1,1], index: 2, kind: output, shape index: {}]  }
   0x1   :  { %8 = vsyncpa [#allocation7], 0 }
   0x2   :  { %9 = vsyncpa [#allocation5], 0  ;;  %s18_s11 = sshll.u32 %s207_s0, 4  ;;  %s178_s12 = smov [#allocation3]   ;;  %s19_s11 = int_to_ptr.hbm [resolvable:$true] %s18_s11 }
   0x3   :  { %s20_s13 = sshll.u32 %s178_s12, 4  ;;  %s35_s16 = sshll.u32 %s208_s1, 4  ;;  %s21_s13 = int_to_ptr.vmem [resolvable:$true] %s20_s13  ;;  %s36_s16 = int_to_ptr.hbm [resolvable:$true] %s35_s16 }
   0x4   :  { %s179_s17 = smov 128   ;;  %s180_s18 = smov 8  }
   0x5   :  { %26 = dma.hbm_to_vmem [thread:$0]  %s19_s11, 256, %s21_s13, [#allocation4], %s179_s17, %s179_s17, %s180_s18  }
   0x6   :  { %s181_s19 = smov [#allocation6]  }
   0x7   :  { %s37_s20 = sshll.u32 %s181_s19, 4  ;;  %s38_s20 = int_to_ptr.vmem [resolvable:$true] %s37_s20 }
   0x8   :  { %43 = dma.hbm_to_vmem [thread:$0]  %s36_s16, 256, %s38_s20, [#allocation7], %s179_s17, %s179_s17, %s180_s18  }
   0x9   :  { %172 = dma.done.wait [#allocation4], 256  }
   0xa   :  { %173 = vsyncadd [#allocation4], 4294967040 }
   0xb   :  { %174 = dma.done.wait [#allocation7], 256  }
   0xc   :  { %175 = vsyncadd [#allocation7], 4294967040  ;;  %v61_v0 = vld [vmem:[#allocation3] sm:$0xff]  ;;  %v62_v1 = vld [vmem:[#allocation3 + $0x8] sm:$0xff]  ;;  %s93_s21 = sshll.u32 %s209_s2, 4  ;;  %s182_s23 = smov [#allocation8]   ;;  %s94_s21 = int_to_ptr.hbm [resolvable:$true] %s93_s21 }
   0xd   :  { %v63_v2 = vld [vmem:[#allocation6] sm:$0xff]  ;;  %v64_v3 = vld [vmem:[#allocation6 + $0x8] sm:$0xff] }
   0xe   :  { %v65_v4 = vsub.f32 %v61_v0, %v63_v2  ;;  %v66_v5 = vsub.f32 %v62_v1, %v64_v3 }
  0x10   :  { %v68_v6 = vmul.f32 %v65_v4, %v65_v4  ;;  %v69_v7 = vmul.f32 %v66_v5, %v66_v5 }
  0x12   :  { %v70_v8 = vadd.f32 %v69_v7, %v68_v6 }
  0x14   :  { %77 = vadd.xlane.f32.xlu0 %v70_v8 }
  0x87   :  { %v78_v9 = vpop.xlane.xlu0 %77 }
  0x88   :  { %v79_v10 = vrot.slane %v78_v9, 4 }
  0x8a   :  { %v80_v11 = vadd.f32 %v79_v10, %v78_v9 }
  0x8c   :  { %v81_v12 = vrot.slane %v80_v11, 2 }
  0x8e   :  { %v82_v13 = vadd.f32 %v81_v12, %v80_v11 }
  0x90   :  { %v83_v14 = vrot.slane %v82_v13, 1 }
  0x92   :  { %v84_v15 = vadd.f32 %v83_v14, %v82_v13 }
  0x94   :  { %105 = vpush %v84_v15 }
  0xc5   :  { %s106_s22 = spop %105 }
  0xc6   :  { %87 = sst [smem:[#allocation8]] %s106_s22 }
  0xc7   :  { %96 = dma.smem_to_hbm %s182_s23, 16, %s94_s21, [#allocation5]  }
  0xc8   :  { %176 = dma.done.wait [#allocation5], 16  }
  0xc9   :  { %177 = vsyncadd [#allocation5], 4294967280 }
  0xca   :  { %101 = sfence }
  0xcb   :  { %102 = vsyncpa [#allocation4], 1 }
  0xcc   :  { %103 = vsyncpa [#allocation7], 1 }
  0xcd   :  { %104 = vsyncpa [#allocation5], 1 }

</bundles_post_ra>
